<compile_context>
chip_gen: v5e
topology: v5e:2x2
jax: 0.10.0
libtpu: 0.0.40
codegen_flags: <defaults>
</compile_context>

<pallas_src>
import jax
import jax.numpy as jnp
from jax.experimental import pallas as pl
from jax.experimental.pallas import tpu as pltpu


_TARGET_BLOCK_BYTES = 2 * 1024 * 1024   # ~2 MiB per block (safe on v5e/v6e/v7x)
_MIN_KERNEL_BYTES = 256 * 1024          # below this, fused XLA jnp.abs is faster


def _abs_kernel(x_ref, o_ref):
    # Elementwise |x| on the whole VMEM tile (pure VPU op).
    o_ref[...] = jnp.abs(x_ref[...])


def pallas_abs(x: jax.Array, *, min_kernel_bytes: int = _MIN_KERNEL_BYTES) -> jax.Array:
    """torch.abs(inputs) equivalent. Preserves shape and dtype exactly."""
    orig_shape = x.shape
    orig_dtype = x.dtype
    n = x.size
    itemsize = jnp.dtype(orig_dtype).itemsize

    # Tiny / degenerate / complex inputs: let XLA handle it (kernel launch
    # overhead dwarfs the work; complex abs changes dtype).
    if (
        n == 0
        or n * itemsize < min_kernel_bytes
        or jnp.issubdtype(orig_dtype, jnp.complexfloating)
    ):
        return jnp.abs(x)

    # ---- Lane-dense 2D view: cols is a multiple of 128. ----
    if n % 512 == 0:
        cols = 512
    elif n % 256 == 0:
        cols = 256
    else:
        cols = 128
    flat = x.reshape(-1)
    pad = (-n) % cols
    if pad:
        flat = jnp.concatenate([flat, jnp.zeros((pad,), dtype=orig_dtype)])
    rows = flat.shape[0] // cols
    x2d = flat.reshape(rows, cols)

    # ---- Row tiling: ~2 MiB blocks, sublane aligned. ----
    sublane = max(8, 32 // itemsize)  # 8 for f32, 16 for bf16, 32 for int8
    max_tm = max(
        sublane,
        (_TARGET_BLOCK_BYTES // (cols * itemsize)) // sublane * sublane,
    )
    if rows <= max_tm:
        tm = rows  # single full-extent row block (exempt from (8,128) rule)
    else:
        tm = max_tm  # multiple of sublane; partial last block is masked by Pallas

    grid = (pl.cdiv(rows, tm),)

    out2d = pl.pallas_call(
        _abs_kernel,
        out_shape=jax.ShapeDtypeStruct((rows, cols), orig_dtype),
        grid=grid,
        in_specs=[pl.BlockSpec((tm, cols), lambda i: (i, 0))],
        out_specs=pl.BlockSpec((tm, cols), lambda i: (i, 0)),
        compiler_params=pltpu.CompilerParams(
            dimension_semantics=("parallel",),   # shards across both TCs on v7x
            vmem_limit_bytes=32 * 1024 * 1024,   # explicit; 4 x 2 MiB buffers fit easily
        ),
    )(x2d)

    out_flat = out2d.reshape(-1)
    if pad:
        out_flat = out_flat[:n]
    return out_flat.reshape(orig_shape)


if __name__ == "__main__":
    key = jax.random.PRNGKey(0)
    k1, k2, k3 = jax.random.split(key, 3)

    # 1) The module's example shape (2,4,16,16). Force the kernel path so the
    #    Pallas kernel itself is exercised even though the tensor is tiny.
    x1 = jax.random.normal(k1, (2, 4, 16, 16), dtype=jnp.float32)
    y1 = pallas_abs(x1, min_kernel_bytes=0)
    jax.block_until_ready(y1)
    assert y1.shape == x1.shape and y1.dtype == x1.dtype
    assert jnp.allclose(y1, jnp.abs(x1)), "mismatch vs jnp.abs (f32 small)"

    # 2) A larger tensor that takes the kernel path naturally and exercises
    #    row tiling (grid > 1) with a partial trailing block.
    x2 = jax.random.normal(k2, (4, 8, 128, 130), dtype=jnp.float32)
    y2 = pallas_abs(x2)
    jax.block_until_ready(y2)
    assert y2.shape == x2.shape and y2.dtype == x2.dtype
    assert jnp.allclose(y2, jnp.abs(x2)), "mismatch vs jnp.abs (f32 tiled)"

    # 3) bf16 with an odd element count: exercises the zero-padded tail path.
    x3 = jax.random.normal(k3, (3, 5, 17, 19), dtype=jnp.bfloat16)
    y3 = pallas_abs(x3, min_kernel_bytes=0)
    jax.block_until_ready(y3)
    assert y3.shape == x3.shape and y3.dtype == x3.dtype
    assert jnp.array_equal(y3, jnp.abs(x3)), "mismatch vs jnp.abs (bf16 padded)"

    print("KERNEL_OK")
</pallas_src>

<mosaic_0001>
module attributes {stable_mosaic.version = 11 : i64} {
  func.func @_abs_kernel(%arg0: i32, %arg1: memref<4x512xf32, #tpu.memory_space<vmem>>, %arg2: memref<4x512xf32, #tpu.memory_space<vmem>>) attributes {dimension_semantics = [#tpu.dimension_semantics<parallel>], iteration_bounds = array<i64: 1>, scalar_prefetch = 0 : i64, scratch_operands = 0 : i64, tpu.core_type = #tpu.core_type<tc>, window_params = [{transform_indices = @transform_0, window_bounds = array<i64: 4, 512>}, {transform_indices = @transform_1, window_bounds = array<i64: 4, 512>}]} {
    %c0 = arith.constant 0 : index
    %c0_0 = arith.constant 0 : index
    %0 = vector.load %arg1[%c0, %c0_0] : memref<4x512xf32, #tpu.memory_space<vmem>>, vector<4x512xf32>
    %1 = math.absf %0 : vector<4x512xf32>
    %c0_1 = arith.constant 0 : index
    %c0_2 = arith.constant 0 : index
    %2 = vector.load %arg2[%c0_1, %c0_2] : memref<4x512xf32, #tpu.memory_space<vmem>>, vector<4x512xf32>
    tpu.vector_store %arg2[%c0_1, %c0_2], %1 {strides = array<i32>} : memref<4x512xf32, #tpu.memory_space<vmem>>, vector<4x512xf32>,
    return
  }
  func.func @transform_0(%arg0: i32) -> (i32, i32) {
    %c0_i32 = arith.constant 0 : i32
    %c0_i32_0 = arith.constant 0 : i32
    return %arg0, %c0_i32 : i32, i32
  }
  func.func @transform_1(%arg0: i32) -> (i32, i32) {
    %c0_i32 = arith.constant 0 : i32
    %c0_i32_0 = arith.constant 0 : i32
    return %arg0, %c0_i32 : i32, i32
  }
}

</mosaic_0001>

<bundles_post_ra>
// kernel: tpu_custom_call.1
= control target key start
LH: loop header
LB: loop body
LE: loop exit
PB: predicated region body
PF: predicated region fallthrough
CT: control target
= control target key end

     0   :  { %6 = vsyncpa [#allocation3], 0  ;;  %s118_s0 = inlined_call_operand.hbm [shape: f32[4,512], index: 0, kind: input, shape index: {}]   ;;  %s119_s1 = inlined_call_operand.hbm [shape: f32[4,512], index: 1, kind: output, shape index: {}]  }
   0x1   :  { %7 = vsyncpa [#allocation4], 0  ;;  %s13_s8 = sshll.u32 %s118_s0, 4  ;;  %s100_s9 = smov [#allocation2]   ;;  %s14_s8 = int_to_ptr.hbm [resolvable:$true] %s13_s8 }
   0x2   :  { %s15_s10 = sshll.u32 %s100_s9, 4  ;;  %s16_s10 = int_to_ptr.vmem [resolvable:$true] %s15_s10 }
   0x3   :  { %18 = dma.hbm_to_vmem [thread:$0]  %s14_s8, 256, %s16_s10, [#allocation3]  }
   0x4   :  { %96 = dma.done.wait [#allocation3], 256  }
   0x5   :  { %97 = vsyncadd [#allocation3], 4294967040  ;;  %s101_s11 = smov [#allocation5]   ;;  %s36_s15 = sshll.u32 %s119_s1, 4  ;;  %v23_v0 = vld [vmem:[#allocation2] sm:$0xff]  ;;  %v24_v1 = vld [vmem:[#allocation2 + $0x8] sm:$0xff]  ;;  %s37_s15 = int_to_ptr.hbm [resolvable:$true] %s36_s15 }
   0x6   :  { %s34_s12 = sshll.u32 %s101_s11, 4  ;;  %v25_v2 = vand.u32 2147483647, %v23_v0  ;;  %v26_v3 = vand.u32 2147483647, %v24_v1  ;;  %s35_s12 = int_to_ptr.vmem [resolvable:$true] %s34_s12 }
   0x8   :  { %27 = vst [vmem:[#allocation5] sm:$0xff] %v25_v2 }
   0x9   :  { %28 = vst [vmem:[#allocation5 + $0x8] sm:$0xff] %v26_v3 }
   0xa   :  { %39 = dma.vmem_to_hbm [thread:$0]  %s35_s12, 256, %s37_s15, [#allocation4]  }
   0xb   :  { %98 = dma.done.wait [#allocation4], 256  }
   0xc   :  { %99 = vsyncadd [#allocation4], 4294967040 }
   0xd   :  { %44 = vsyncpa [#allocation3], 1 }
   0xe   :  { %45 = vsyncpa [#allocation4], 1 }

</bundles_post_ra>
